<compile_context>
chip_gen: v5e
topology: v5e:2x2
jax: 0.10.0
libtpu: 0.0.40
codegen_flags: <defaults>
</compile_context>

<pallas_src>
import functools

import jax
import jax.numpy as jnp
import numpy as np
from jax import lax
from jax.experimental import pallas as pl
from jax.experimental.pallas import tpu as pltpu

SOFTCAP = 30.0

# Contract the LAST dim of lhs with the LAST dim of rhs (== lhs @ rhs.T) without
# materializing a transposed weight tile.
_DN_XWT = (((1,), (1,)), ((), ()))
# Standard matmul: contract lhs last dim with rhs first dim.
_DN_STD = (((1,), (0,)), ((), ()))


def _round_up(x, m):
    return ((x + m - 1) // m) * m


def _choose_divisor_tile(dim, requested, lane_align=128, sublane_align=8):
    """Largest tile <= min(requested, dim) dividing dim, preferring 128-alignment."""
    cap = max(1, min(requested, dim))
    for align in (lane_align, sublane_align):
        start = cap - (cap % align)
        for t in range(start, 0, -align):
            if dim % t == 0:
                return t
    return dim


def _grouped_moe_kernel(te_ref, tb_ref, x_ref, w_ref, w1_ref, w3_ref, w2_ref,
                        o_ref, acc_ref):
    """Grid = (row_tiles, I_tiles) over expert-grouped token rows.

    te_ref : SMEM (n_tiles,) int32 -- expert id owning each row tile (forward-filled)
    tb_ref : SMEM (n_tiles,) int32 -- row-block index for x / weight rows
             (tb[m] == m for real tiles; tail padding tiles repeat the last real
              block index so their input DMAs are elided)
    x_ref  : (tm, H)  bf16  expert-grouped (permuted) token rows
    w_ref  : (tm, 1)  f32   per-row routing weights (0 on padding rows)
    w1_ref : (1, ti, H) bf16 gate-proj tile of w13 (rows [0, I))
    w3_ref : (1, ti, H) bf16 up-proj tile of w13 (rows [I, 2I))
    w2_ref : (1, ti, H) bf16 down-proj tile of w2 pre-transposed to (E, I, H)
    acc_ref: (tm, H) f32 VMEM accumulator (resident across the I-tile axis)
    """
    m = pl.program_id(0)
    i = pl.program_id(1)
    n_i = pl.num_programs(1)

    @pl.when(i == 0)
    def _():
        acc_ref[...] = jnp.zeros_like(acc_ref)

    # Real tiles have tb[m] == m; tail padding tiles were forward-filled and are
    # pure no-ops (their weight/x block indices repeat the previous tile's, so no
    # DMAs are issued either).
    @pl.when(tb_ref[m] == m)
    def _():
        x = x_ref[...]                                                     # (tm, H) bf16
        w1 = w1_ref[0]                                                     # (ti, H) bf16
        w3 = w3_ref[0]                                                     # (ti, H) bf16
        w2 = w2_ref[0]                                                     # (ti, H) bf16

        # bf16 MXU matmuls, f32 accumulation.
        g = lax.dot_general(x, w1, _DN_XWT, preferred_element_type=jnp.float32)
        u = lax.dot_general(x, w3, _DN_XWT, preferred_element_type=jnp.float32)
        # TODO(synk): sglang's gelu_and_mul uses exact (erf) GELU; the tanh
        # approximation is used here since erf lowering in Mosaic is not guaranteed.
        a = jax.nn.gelu(g, approximate=True) * u                           # (tm, ti) f32
        # Fold the per-row routing weight in before the down projection (padding
        # rows carry weight 0 but point at a real token's data, so no 0*inf risk).
        a = a * w_ref[...]                                                 # (tm, 1) bcast
        acc_ref[...] += lax.dot_general(a.astype(w2.dtype), w2, _DN_STD,
                                        preferred_element_type=jnp.float32)

    @pl.when(i == n_i - 1)
    def _():
        o_ref[...] = acc_ref[...].astype(o_ref.dtype)


def prepare_grok1_moe_weights(w13, w2):
    """One-time weight-load transform.

    w2 (E, H, I) -> (E, I, H) so every down-projection tile becomes a contiguous
    (1, ti, H) DMA instead of a strided slice of H tiny rows.  Do this once at
    load time, not per forward call.
    """
    return w13, jnp.swapaxes(w2, 1, 2)


@functools.partial(
    jax.jit,
    static_argnames=("top_k", "softcap", "block_t", "block_i", "vmem_limit_bytes"),
)
def grok1_moe(x, gate_w, w13, w2t, top_k, softcap=SOFTCAP,
              block_t=512, block_i=256, vmem_limit_bytes=None):
    """Grok-1 MoE block (router + grouped fused experts).

    x      : (T, H)      bf16 hidden states
    gate_w : (E, H)      f32 router weight
    w13    : (E, 2I, H)  bf16 gate||up projections (passed as-is, never sliced)
    w2t    : (E, I, H)   bf16 down projection, pre-transposed via
                         prepare_grok1_moe_weights()
    top_k  : experts per token (renormalize=False)

    Per-generation tuning for Grok-1 shapes (H=6144, large I):
      v7x (64 MiB VMEM):  block_t=256-384, block_i=256, vmem_limit_bytes ~48-56 MiB
      v6e (128 MiB VMEM): block_t=512,     block_i=512, vmem_limit_bytes ~96-110 MiB
      v5e (128 MiB VMEM): block_t=256,     block_i=512, vmem_limit_bytes ~64-96 MiB
    The token tile is clamped to the number of routed rows, so decode automatically
    runs with small tiles; the grouped row-tile axis is marked "parallel" so its
    >= top_k tiles spread across both TensorCores on v7x.
    """
    T, H = x.shape
    E, two_i, _ = w13.shape
    I = two_i // 2
    assert w2t.shape == (E, I, H), "pass w2 through prepare_grok1_moe_weights()"

    # ---- Router (XLA glue): logits -> softcap -> softmax -> top-k. ----
    xf = x.astype(jnp.float32)
    logits = xf @ gate_w.T.astype(jnp.float32)                            # (T, E)
    capped = softcap * jnp.tanh(logits / softcap)
    probs = jax.nn.softmax(capped, axis=-1)
    vals, idx = jax.lax.top_k(probs, top_k)                               # (T, K)

    # ---- Token grouping (megablocks-style). ----
    S = T * top_k                                                         # routed rows
    tm = max(16, min((block_t // 16) * 16, _round_up(S, 16)))             # bf16 packing
    ti = _choose_divisor_tile(I, block_i)

    # Static upper bound on sum_e ceil(g_e / tm): each non-empty expert adds at
    # most one partially-filled tile.
    nz_max = min(E, S)
    n_tiles = nz_max + (S - nz_max) // tm
    s_pad = n_tiles * tm

    flat_e = idx.reshape(-1).astype(jnp.int32)                            # (S,)
    flat_t = jnp.repeat(jnp.arange(T, dtype=jnp.int32), top_k)            # (S,)
    flat_w = vals.reshape(-1).astype(jnp.float32)                         # (S,)

    order = jnp.argsort(flat_e)
    sorted_e = flat_e[order]
    sorted_t = flat_t[order]
    sorted_w = flat_w[order]

    group_sizes = jnp.sum(jax.nn.one_hot(flat_e, E, dtype=jnp.int32), axis=0)  # (E,)
    group_start = jnp.cumsum(group_sizes) - group_sizes
    padded_sizes = ((group_sizes + tm - 1) // tm) * tm
    cum_padded = jnp.cumsum(padded_sizes)
    padded_start = cum_padded - padded_sizes
    n_valid_tiles = cum_padded[-1] // tm

    # Destination row (in the padded, expert-grouped layout) of each routed row.
    rank = jnp.arange(S, dtype=jnp.int32) - group_start[sorted_e]
    dest = padded_start[sorted_e] + rank                                  # (S,)

    row_token = jnp.zeros((s_pad,), jnp.int32).at[dest].set(sorted_t)     # pad -> token 0
    row_weight = jnp.zeros((s_pad,), jnp.float32).at[dest].set(sorted_w)[:, None]
    x_rows = jnp.take(x, row_token, axis=0)                               # (s_pad, H)

    # ---- Per-tile scalar-prefetch metadata. ----
    m_idx = jnp.arange(n_tiles, dtype=jnp.int32)
    # Row-block index: identity for real tiles, forward-filled for tail padding
    # tiles (same consecutive block index => x / weight DMAs are elided).
    tb = jnp.minimum(m_idx, jnp.maximum(n_valid_tiles - 1, 0)).astype(jnp.int32)
    te_raw = jnp.searchsorted(cum_padded, m_idx * tm, side="right").astype(jnp.int32)
    te = jnp.minimum(te_raw, E - 1)[tb]                                   # expert per tile

    n_i = I // ti
    grid = (n_tiles, n_i)

    out_rows = pl.pallas_call(
        _grouped_moe_kernel,
        out_shape=jax.ShapeDtypeStruct((s_pad, H), x.dtype),
        grid_spec=pltpu.PrefetchScalarGridSpec(
            num_scalar_prefetch=2,
            grid=grid,
            in_specs=[
                # Permuted activations / routing weights (tail tiles repeat the last
                # real block index -> no extra DMA).
                pl.BlockSpec((tm, H), lambda m, i, te, tb: (tb[m], 0)),
                pl.BlockSpec((tm, 1), lambda m, i, te, tb: (tb[m], 0)),
                # w13 passed twice (never sliced in XLA): gate rows live in blocks
                # [0, I//ti), up rows in blocks [I//ti, 2I//ti).
                pl.BlockSpec((1, ti, H), lambda m, i, te, tb: (te[m], i, 0)),
                pl.BlockSpec((1, ti, H), lambda m, i, te, tb: (te[m], i + I // ti, 0)),
                # w2 pre-transposed to (E, I, H): contiguous (1, ti, H) tiles.
                pl.BlockSpec((1, ti, H), lambda m, i, te, tb: (te[m], i, 0)),
            ],
            out_specs=pl.BlockSpec((tm, H), lambda m, i, te, tb: (m, 0)),
            scratch_shapes=[pltpu.VMEM((tm, H), jnp.float32)],
        ),
        compiler_params=pltpu.CompilerParams(
            dimension_semantics=("parallel", "arbitrary"),
            vmem_limit_bytes=vmem_limit_bytes,
        ),
    )(te, tb, x_rows, row_weight, w13, w13, w2t)

    # ---- Un-permute + combine (weights already folded in-kernel). ----
    gathered = jnp.take(out_rows, dest, axis=0).astype(jnp.float32)       # (S, H)
    out = jnp.zeros((T, H), jnp.float32).at[sorted_t].add(gathered)
    return out.astype(x.dtype)


def _reference(x, gate_w, w13, w2, top_k, softcap=SOFTCAP):
    """Plain-JAX dense reference mirroring the module semantics."""
    E, two_i, H = w13.shape
    I = two_i // 2
    xf = x.astype(jnp.float32)
    logits = xf @ gate_w.T
    capped = softcap * jnp.tanh(logits / softcap)
    probs = jax.nn.softmax(capped, axis=-1)
    vals, idx = jax.lax.top_k(probs, top_k)
    combine = jnp.sum(jax.nn.one_hot(idx, E, dtype=jnp.float32) * vals[..., None], axis=1)
    w1 = w13[:, :I, :].astype(jnp.float32)
    w3 = w13[:, I:, :].astype(jnp.float32)
    w2f = w2.astype(jnp.float32)
    g = jnp.einsum("th,eih->tei", xf, w1)
    u = jnp.einsum("th,eih->tei", xf, w3)
    a = jax.nn.gelu(g, approximate=True) * u
    o = jnp.einsum("tei,ehi->teh", a, w2f)
    return jnp.einsum("te,teh->th", combine, o).astype(x.dtype)


if __name__ == "__main__":
    # Small, forward-consistent shapes: 16 tokens, hidden=128, intermediate=256,
    # num_experts=8, top_k=2.  block_t=16 / block_i=128 exercise the grouped
    # row-tile path, tail-padding tiles, and I-tile accumulation.
    T, H, I, E, K = 16, 128, 256, 8, 2
    key = jax.random.PRNGKey(0)
    k1, k2, k3, k4 = jax.random.split(key, 4)

    x = jax.random.normal(k1, (T, H), jnp.float32).astype(jnp.bfloat16)
    gate_w = jax.random.normal(k2, (E, H), jnp.float32) * 0.1              # fp32 gate
    w13 = (jax.random.normal(k3, (E, 2 * I, H), jnp.float32) * 0.05).astype(jnp.bfloat16)
    w2 = (jax.random.normal(k4, (E, H, I), jnp.float32) * 0.05).astype(jnp.bfloat16)

    # One-time weight-load transform (w2 -> (E, I, H)).
    w13p, w2t = prepare_grok1_moe_weights(w13, w2)

    # TODO(synk): tensor/expert-parallel all-reduce (reduce_results) is a
    # multi-device collective; this single-device kernel covers tp_size=1.
    # TODO(synk): attention / RMSNorm / embedding parts of Grok1Model are not
    # kernelized here; this covers the Grok1MoE block (router + fused experts).
    # TODO(synk): a boundary-spanning (unpadded) megablocks grid would remove the
    # remaining per-group tile padding; the padded-group form is used for simplicity.
    out = jax.block_until_ready(
        grok1_moe(x, gate_w, w13p, w2t, K, block_t=16, block_i=128)
    )
    ref = _reference(x, gate_w, w13, w2, K)

    np.testing.assert_allclose(
        np.asarray(out, dtype=np.float32),
        np.asarray(ref, dtype=np.float32),
        rtol=3e-2, atol=3e-2,
    )
    print("KERNEL_OK")
</pallas_src>

<mosaic_0001>
module attributes {stable_mosaic.version = 11 : i64} {
  func.func @_grouped_moe_kernel(%arg0: i32, %arg1: i32, %arg2: memref<9xi32, #tpu.memory_space<smem>>, %arg3: memref<9xi32, #tpu.memory_space<smem>>, %arg4: memref<16x128xbf16, #tpu.memory_space<vmem>>, %arg5: memref<16x1xf32, #tpu.memory_space<vmem>>, %arg6: memref<1x128x128xbf16, #tpu.memory_space<vmem>>, %arg7: memref<1x128x128xbf16, #tpu.memory_space<vmem>>, %arg8: memref<1x128x128xbf16, #tpu.memory_space<vmem>>, %arg9: memref<16x128xbf16, #tpu.memory_space<vmem>>, %arg10: memref<16x128xf32, #tpu.memory_space<vmem>>) attributes {dimension_semantics = [#tpu.dimension_semantics<parallel>, #tpu.dimension_semantics<arbitrary>], iteration_bounds = array<i64: 9, 2>, scalar_prefetch = 2 : i64, scratch_operands = 1 : i64, tpu.core_type = #tpu.core_type<tc>, window_params = [{transform_indices = @transform_0, window_bounds = array<i64: 16, 128>}, {transform_indices = @transform_1, window_bounds = array<i64: 16, 1>}, {transform_indices = @transform_2, window_bounds = array<i64: 1, 128, 128>}, {transform_indices = @transform_3, window_bounds = array<i64: 1, 128, 128>}, {transform_indices = @transform_4, window_bounds = array<i64: 1, 128, 128>}, {transform_indices = @transform_5, window_bounds = array<i64: 16, 128>}]} {
    %c0_i32 = arith.constant 0 : i32
    %0 = arith.cmpi eq, %arg1, %c0_i32 : i32
    %1 = arith.extui %0 : i1 to i32
    %c0_i32_0 = arith.constant 0 : i32
    %2 = arith.cmpi ne, %1, %c0_i32_0 : i32
    scf.if %2 {
      %cst = arith.constant 0.000000e+00 : f32
      %11 = vector.broadcast %cst : f32 to vector<16x128xf32>
      %c0 = arith.constant 0 : index
      %c0_3 = arith.constant 0 : index
      %12 = vector.load %arg10[%c0, %c0_3] : memref<16x128xf32, #tpu.memory_space<vmem>>, vector<16x128xf32>
      tpu.vector_store %arg10[%c0, %c0_3], %11 {strides = array<i32>} : memref<16x128xf32, #tpu.memory_space<vmem>>, vector<16x128xf32>,
    } else {
    }
    %3 = arith.index_cast %arg0 : i32 to index
    %4 = memref.load %arg3[%3] : memref<9xi32, #tpu.memory_space<smem>>
    %5 = arith.cmpi eq, %4, %arg0 : i32
    %6 = arith.extui %5 : i1 to i32
    %c0_i32_1 = arith.constant 0 : i32
    %7 = arith.cmpi ne, %6, %c0_i32_1 : i32
    scf.if %7 {
      %c0 = arith.constant 0 : index
      %c0_3 = arith.constant 0 : index
      %11 = vector.load %arg4[%c0, %c0_3] : memref<16x128xbf16, #tpu.memory_space<vmem>>, vector<16x128xbf16>
      %c0_4 = arith.constant 0 : index
      %c0_5 = arith.constant 0 : index
      %c0_6 = arith.constant 0 : index
      %12 = vector.load %arg6[%c0_4, %c0_5, %c0_6] : memref<1x128x128xbf16, #tpu.memory_space<vmem>>, vector<1x128x128xbf16>
      %13 = vector.shape_cast %12 : vector<1x128x128xbf16> to vector<128x128xbf16>
      %c0_7 = arith.constant 0 : index
      %c0_8 = arith.constant 0 : index
      %c0_9 = arith.constant 0 : index
      %14 = vector.load %arg7[%c0_7, %c0_8, %c0_9] : memref<1x128x128xbf16, #tpu.memory_space<vmem>>, vector<1x128x128xbf16>
      %15 = vector.shape_cast %14 : vector<1x128x128xbf16> to vector<128x128xbf16>
      %c0_10 = arith.constant 0 : index
      %c0_11 = arith.constant 0 : index
      %c0_12 = arith.constant 0 : index
      %16 = vector.load %arg8[%c0_10, %c0_11, %c0_12] : memref<1x128x128xbf16, #tpu.memory_space<vmem>>, vector<1x128x128xbf16>
      %17 = vector.shape_cast %16 : vector<1x128x128xbf16> to vector<128x128xbf16>
      %cst = arith.constant dense<0.000000e+00> : vector<16x128xf32>
      %18 = tpu.matmul %11, %13, %cst {dimension_numbers = #tpu.dot_dimension_numbers<[1], [1], [0], [0], [0, 0, 1, 0], [], []>} : vector<16x128xbf16>, vector<128x128xbf16>, vector<16x128xf32> -> vector<16x128xf32>
      %cst_13 = arith.constant dense<0.000000e+00> : vector<16x128xf32>
      %19 = tpu.matmul %11, %15, %cst_13 {dimension_numbers = #tpu.dot_dimension_numbers<[1], [1], [0], [0], [0, 0, 1, 0], [], []>} : vector<16x128xbf16>, vector<128x128xbf16>, vector<16x128xf32> -> vector<16x128xf32>
      %20 = arith.mulf %18, %18 : vector<16x128xf32>
      %21 = arith.mulf %18, %20 : vector<16x128xf32>
      %cst_14 = arith.constant 4.471500e-02 : f32
      %22 = vector.broadcast %cst_14 : f32 to vector<16x128xf32>
      %23 = arith.mulf %22, %21 : vector<16x128xf32>
      %24 = arith.addf %18, %23 : vector<16x128xf32>
      %cst_15 = arith.constant 0.797884583 : f32
      %25 = vector.broadcast %cst_15 : f32 to vector<16x128xf32>
      %26 = arith.mulf %25, %24 : vector<16x128xf32>
      %27 = math.tanh %26 : vector<16x128xf32>
      %cst_16 = arith.constant 1.000000e+00 : f32
      %28 = vector.broadcast %cst_16 : f32 to vector<16x128xf32>
      %29 = arith.addf %28, %27 : vector<16x128xf32>
      %cst_17 = arith.constant 5.000000e-01 : f32
      %30 = vector.broadcast %cst_17 : f32 to vector<16x128xf32>
      %31 = arith.mulf %30, %29 : vector<16x128xf32>
      %32 = arith.mulf %18, %31 : vector<16x128xf32>
      %33 = arith.mulf %32, %19 : vector<16x128xf32>
      %c0_18 = arith.constant 0 : index
      %c0_19 = arith.constant 0 : index
      %34 = vector.load %arg5[%c0_18, %c0_19] : memref<16x1xf32, #tpu.memory_space<vmem>>, vector<16x1xf32>
      %35 = vector.broadcast %34 : vector<16x1xf32> to vector<16x128xf32>
      %36 = arith.mulf %33, %35 : vector<16x128xf32>
      %c0_20 = arith.constant 0 : index
      %c0_21 = arith.constant 0 : index
      %37 = vector.load %arg10[%c0_20, %c0_21] : memref<16x128xf32, #tpu.memory_space<vmem>>, vector<16x128xf32>
      %38 = arith.truncf %36 : vector<16x128xf32> to vector<16x128xbf16>
      %cst_22 = arith.constant dense<0.000000e+00> : vector<16x128xf32>
      %39 = tpu.matmul %38, %17, %cst_22 {dimension_numbers = #tpu.dot_dimension_numbers<[1], [0], [0], [1], [0, 0, 1, 1], [], []>} : vector<16x128xbf16>, vector<128x128xbf16>, vector<16x128xf32> -> vector<16x128xf32>
      %40 = arith.addf %37, %39 : vector<16x128xf32>
      %c0_23 = arith.constant 0 : index
      %c0_24 = arith.constant 0 : index
      %41 = vector.load %arg10[%c0_23, %c0_24] : memref<16x128xf32, #tpu.memory_space<vmem>>, vector<16x128xf32>
      tpu.vector_store %arg10[%c0_23, %c0_24], %40 {strides = array<i32>} : memref<16x128xf32, #tpu.memory_space<vmem>>, vector<16x128xf32>,
    } else {
    }
    %c1_i32 = arith.constant 1 : i32
    %8 = arith.cmpi eq, %arg1, %c1_i32 : i32
    %9 = arith.extui %8 : i1 to i32
    %c0_i32_2 = arith.constant 0 : i32
    %10 = arith.cmpi ne, %9, %c0_i32_2 : i32
    scf.if %10 {
      %c0 = arith.constant 0 : index
      %c0_3 = arith.constant 0 : index
      %11 = vector.load %arg10[%c0, %c0_3] : memref<16x128xf32, #tpu.memory_space<vmem>>, vector<16x128xf32>
      %12 = arith.truncf %11 : vector<16x128xf32> to vector<16x128xbf16>
      %c0_4 = arith.constant 0 : index
      %c0_5 = arith.constant 0 : index
      %13 = vector.load %arg9[%c0_4, %c0_5] : memref<16x128xbf16, #tpu.memory_space<vmem>>, vector<16x128xbf16>
      tpu.vector_store %arg9[%c0_4, %c0_5], %12 {strides = array<i32>} : memref<16x128xbf16, #tpu.memory_space<vmem>>, vector<16x128xbf16>,
    } else {
    }
    return
  }
  func.func @transform_0(%arg0: i32, %arg1: i32, %arg2: memref<9xi32, #tpu.memory_space<smem>>, %arg3: memref<9xi32, #tpu.memory_space<smem>>) -> (i32, i32) {
    %0 = arith.index_cast %arg0 : i32 to index
    %1 = memref.load %arg3[%0] : memref<9xi32, #tpu.memory_space<smem>>
    %c0_i32 = arith.constant 0 : i32
    %c0_i32_0 = arith.constant 0 : i32
    return %1, %c0_i32 : i32, i32
  }
  func.func @transform_1(%arg0: i32, %arg1: i32, %arg2: memref<9xi32, #tpu.memory_space<smem>>, %arg3: memref<9xi32, #tpu.memory_space<smem>>) -> (i32, i32) {
    %0 = arith.index_cast %arg0 : i32 to index
    %1 = memref.load %arg3[%0] : memref<9xi32, #tpu.memory_space<smem>>
    %c0_i32 = arith.constant 0 : i32
    %c0_i32_0 = arith.constant 0 : i32
    return %1, %c0_i32 : i32, i32
  }
  func.func @transform_2(%arg0: i32, %arg1: i32, %arg2: memref<9xi32, #tpu.memory_space<smem>>, %arg3: memref<9xi32, #tpu.memory_space<smem>>) -> (i32, i32, i32) {
    %0 = arith.index_cast %arg0 : i32 to index
    %1 = memref.load %arg2[%0] : memref<9xi32, #tpu.memory_space<smem>>
    %c0_i32 = arith.constant 0 : i32
    %c0_i32_0 = arith.constant 0 : i32
    return %1, %arg1, %c0_i32 : i32, i32, i32
  }
  func.func @transform_3(%arg0: i32, %arg1: i32, %arg2: memref<9xi32, #tpu.memory_space<smem>>, %arg3: memref<9xi32, #tpu.memory_space<smem>>) -> (i32, i32, i32) {
    %0 = arith.index_cast %arg0 : i32 to index
    %1 = memref.load %arg2[%0] : memref<9xi32, #tpu.memory_space<smem>>
    %c2_i32 = arith.constant 2 : i32
    %2 = arith.addi %arg1, %c2_i32 : i32
    %c0_i32 = arith.constant 0 : i32
    %c0_i32_0 = arith.constant 0 : i32
    return %1, %2, %c0_i32 : i32, i32, i32
  }
  func.func @transform_4(%arg0: i32, %arg1: i32, %arg2: memref<9xi32, #tpu.memory_space<smem>>, %arg3: memref<9xi32, #tpu.memory_space<smem>>) -> (i32, i32, i32) {
    %0 = arith.index_cast %arg0 : i32 to index
    %1 = memref.load %arg2[%0] : memref<9xi32, #tpu.memory_space<smem>>
    %c0_i32 = arith.constant 0 : i32
    %c0_i32_0 = arith.constant 0 : i32
    return %1, %arg1, %c0_i32 : i32, i32, i32
  }
  func.func @transform_5(%arg0: i32, %arg1: i32, %arg2: memref<9xi32, #tpu.memory_space<smem>>, %arg3: memref<9xi32, #tpu.memory_space<smem>>) -> (i32, i32) {
    %c0_i32 = arith.constant 0 : i32
    %c0_i32_0 = arith.constant 0 : i32
    return %arg0, %c0_i32 : i32, i32
  }
}

</mosaic_0001>

<bundles_post_ra>
// kernel: custom-call
= control target key start
LH: loop header
LB: loop body
LE: loop exit
PB: predicated region body
PF: predicated region fallthrough
CT: control target
= control target key end

     0   :  { %s6_s0 = inlined_call_operand.vmem [shape: u32[9], index: 0, kind: output, shape index: {}]  }

// kernel: grok1_moe.1
= control target key start
LH: loop header
LB: loop body
LE: loop exit
PB: predicated region body
PF: predicated region fallthrough
CT: control target
= control target key end

     0   :  { %s1137_s30 = smov [#allocation4]   ;;  %s1138_s8 = smov [#allocation5]   ;;  %s1314_s0 = inlined_call_operand.vmem [shape: s32[9], index: 0, kind: input, shape index: {}]   ;;  %s1315_s2 = inlined_call_operand.vmem [shape: bf16[144,128], index: 2, kind: input, shape index: {}]   ;;  %s1316_s3 = inlined_call_operand.vmem [shape: f32[144,1], index: 3, kind: input, shape index: {}]   ;;  %s1317_s4 = inlined_call_operand.vmem [shape: bf16[8,512,128], index: 4, kind: input, shape index: {}, may-alias: {4,5}]   ;;  %s1318_s5 = inlined_call_operand.vmem [shape: bf16[8,512,128], index: 5, kind: input, shape index: {}, may-alias: {4,5}]   ;;  %s1319_s6 = inlined_call_operand.vmem [shape: bf16[8,256,128], index: 6, kind: input, shape index: {}]   ;;  %s1320_s7 = inlined_call_operand.vmem [shape: bf16[144,128], index: 7, kind: output, shape index: {}]   ;;  %s1321_s1 = inlined_call_operand.vmem [shape: s32[9], index: 1, kind: input, shape index: {}]  }
   0x1   :  { %1322 = sst [smem:[#allocation8_spill]] %s1315_s2  ;;  %s13_s26 = sshll.u32 %s1314_s0, 4  ;;  %s14_s26 = int_to_ptr.vmem [resolvable:$true] %s13_s26 }
   0x2   :  { %s18_s29 = sshll.u32 %s1321_s1, 4  ;;  %s19_s29 = int_to_ptr.vmem [resolvable:$true] %s18_s29 }
   0x3   :  { %16 = dma.vmem_to_smem %s14_s26, 16, %s1137_s30, [#allocation3] }
   0x4   :  { %21 = dma.vmem_to_smem %s19_s29, 16, %s1138_s8, [#allocation3] }
   0x5   :  { %1115 = dma.done.wait [#allocation3], 32 }
   0x6   :  { %1116 = vsyncadd [#allocation3], 4294967264 }
   0x7   :  { %24 = sfence }
   0x8   :  { %s1187_s9 = smov 0   ;;  %s1189_s10 = smov 0  }
   0x9   :  { %s1191_s11 = smov 0   ;;  %s1193_s0 = smov 0  }
   0xa   :  { %s1195_s12 = smov 0  }
   0xb LB: > { %s39_s1 = sadd.s32 1, %s1127_s11  ;;  %s42_s13 = sadd.s32 1, %s1131_s0  ;;  %s1135_s12 = sphi %s1195_s12, %s30_s12   ;;  %s1131_s0 = sphi %s1193_s0, %s1329_s0   ;;  %s1127_s11 = sphi %s1191_s11, %s1328_s11   ;;  %s1123_s10 = sphi %s1189_s10, %s1327_s10   ;;  %s1119_s9 = sphi %s1187_s9, %s1326_s9  }
   0xc   : > { %p40_p0 = scmp.ge.s32.totalorder %s39_s1, 2  ;;  %p869_p1 = scmp.ge.s32.totalorder %s1135_s12, 1 }
   0xd   : > { %p301_p2 = scmp.lt.s32.totalorder %s1135_s12, 19 }
   0xe   : > { %s1331_s1 = smov (%p40_p0, %s39_s1), 0  ;;  %s1333_s13 = smov (!%p40_p0, %s42_s13), %s1131_s0 }
   0xf   : > { %p302_p3 = pnand %p869_p1, %p301_p2  ;;  %p44_p4 = scmp.ge.s32.totalorder %s1333_s13, 9 }
  0x10   : > { %s367_s14 = sld [smem:[#allocation5 + %s1123_s10]] (!%p302_p3)  ;;  %s1223_s15 = sshll.u32 (!%p302_p3), %s1119_s9, 4 }
  0x11   : > { %s1335_s13 = smov (%p44_p4, %s1333_s13), 0  ;;  %305 = sbr.rel (%p302_p3) target bundleno = 445 (0x1bd), region = 40 }
  0x12   : > { %1323 = sst [smem:[#allocation7_spill]] %s1335_s13  ;;  %p387_p5 = scmp.lt.s32.totalorder (!%p302_p3), %s1223_s15, 63 }
  0x13   : > { %s375_s16 = sld [smem:[#allocation5 + %s1123_s10]] (!%p302_p3)  ;;  %s991_s19 = sadd.s32 (!%p302_p3), 32, %s1223_s15 }
  0x14   : > { %s383_s17 = sld [smem:[#allocation4 + %s1123_s10]] (!%p302_p3)  ;;  %p400_p10 = scmp.lt.s32.totalorder (!%p302_p3), %s991_s19, 63 }
  0x15   : > { %s395_s18 = sld [smem:[#allocation4 + %s1123_s10]] (!%p302_p3)  ;;  %p413_p11 = scmp.lt.s32.totalorder (!%p302_p3), %s1223_s15, 31 }
  0x16   : > { %s388_s20 = scalar_select %p387_p5, %s1223_s15, 63 }
  0x17   : > { %s870_s21 = sshll.u32 %s367_s14, 1  ;;  %s409_s22 = sld [smem:[#allocation4 + %s1123_s10]] }
  0x18   : > { %p369_p6 = scmp.lt.s32.totalorder %s870_s21, 17  ;;  %s1324_s2 = sld [smem:[#allocation8_spill]] }
  0x19   : > { %s872_s23 = sshll.u32 %s375_s16, 1  ;;  %s883_s13 = sshll.u32 %s1123_s10, 1 }
  0x1a   : > { %p377_p7 = scmp.lt.s32.totalorder %s872_s23, 17  ;;  %p385_p8 = scmp.lt.s32.totalorder %s383_s17, 7 }
  0x1b   : > { %s1337_s21 = smov (!%p369_p6, %s870_s21), 17  ;;  %p398_p9 = scmp.lt.s32.totalorder %s395_s18, 7 }
  0x1c   : > { %s1339_s23 = smov (!%p377_p7, %s872_s23), 17  ;;  %s871_s24 = sshll.u32 %s1337_s21, 2 }
  0x1d   : > { %s873_s28 = sshll.u32 %s1339_s23, 3  ;;  %s1341_s17 = smov (!%p385_p8, %s383_s17), 7 }
  0x1e   : > { %s1235_s27 = scalar_lea.vmem %s1324_s2, %s871_s24  ;;  %s1240_s8 = scalar_lea.vmem %s1316_s3, %s873_s28 }
  0x1f   : > { %s1343_s18 = smov (!%p398_p9, %s395_s18), 7  ;;  %s875_s14 = sshll.u32 %s1341_s17, 6 }
  0x20   : > { %s390_s16 = sadd.s32 %s875_s14, %s388_s20  ;;  %p411_p12 = scmp.lt.s32.totalorder %s409_s22, 7 }
  0x21   : > { %s876_s21 = sshll.u32 %s390_s16, 2  ;;  %s878_s26 = sshll.u32 %s1343_s18, 6 }
  0x22   : > { %s1247_s23 = scalar_lea.vmem %s1317_s4, %s876_s21  ;;  %s1345_s19 = smov (!%p400_p10, %s991_s19), 63 }
  0x23   : > { %s1347_s22 = smov (!%p411_p12, %s409_s22), 7  ;;  %s403_s28 = sadd.s32 %s878_s26, %s1345_s19 }
  0x24   : > { %p422_p13 = scmp.lt.s32.totalorder %s883_s13, 17  ;;  %s879_s29 = sshll.u32 %s403_s28, 2 }
  0x25   : > { %s1252_s17 = scalar_lea.vmem %s1318_s5, %s879_s29  ;;  %s881_s20 = sshll.u32 %s1347_s22, 5 }
  0x26   : > { %s1349_s15 = smov (!%p413_p11, %s1223_s15), 31  ;;  %s1351_s13 = smov (!%p422_p13, %s883_s13), 17 }
  0x27   : > { %s416_s14 = sadd.s32 %s881_s20, %s1349_s15  ;;  %s884_s25 = sshll.u32 %s1351_s13, 2 }
  0x28   : > { %s882_s16 = sshll.u32 %s416_s14, 2  ;;  %s1265_s28 = scalar_lea.vmem %s1320_s7, %s884_s25 }
  0x29   : > { %s1260_s18 = scalar_lea.vmem %s1319_s6, %s882_s16  ;;  %p885_p0 = scmp.ne.s32.totalorder %s1119_s9, 0 }
  0x2b   : > { %430 = sbr.rel (%p885_p0) target bundleno = 51 (0x33), region = 44 }
  0x30   : > { %v1139_v0 = vmov 0.0  }
  0x31   : > { %431 = vst [vmem:[#allocation2] sm:$0xff] %v1139_v0 }
  0x32   : > { %432 = vst [vmem:[#allocation2 + $0x8] sm:$0xff] %v1139_v0 }
  0x33 PF: > { %s433_s2 = sld [smem:[#allocation5 + %s1123_s10]] }
  0x39   : > { %p886_p1 = scmp.ne.s32.totalorder %s433_s2, %s1123_s10 }
  0x3b   : > { %437 = sbr.rel (%p886_p1) target bundleno = 434 (0x1b2), region = 48 }
  0x40   : > { %v1000_v1 = vld [vmem:[%s1247_s23 + $0x38] sm:$0xff]  ;;  %v999_v3 = vld [vmem:[%s1247_s23 + $0x30] sm:$0xff]  ;;  %v998_v5 = vld [vmem:[%s1247_s23 + $0x28] sm:$0xff]  ;;  %v1140_v12 = vmov 0  }
  0x41   : > { %v1008_v2 = vld [vmem:[%s1252_s17 + $0x38] sm:$0xff]  ;;  %542 = vmatpush.bf16.xpose.msra.mxu0 %v1000_v1  ;;  %v1007_v4 = vld [vmem:[%s1252_s17 + $0x30] sm:$0xff]  ;;  %v1006_v6 = vld [vmem:[%s1252_s17 + $0x28] sm:$0xff]  ;;  %1066 = vset.pattern.permute.xlu0 %v1140_v12 }
  0x42   : > { %604 = vmatpush.bf16.xpose.msra.mxu1 %v1008_v2  ;;  %v997_v7 = vld [vmem:[%s1247_s23 + $0x20] sm:$0xff]  ;;  %v996_v9 = vld [vmem:[%s1247_s23 + $0x18] sm:$0xff]  ;;  %v995_v13 = vld [vmem:[%s1247_s23 + $0x10] sm:$0xff] }
  0x43   : > { %v1005_v8 = vld [vmem:[%s1252_s17 + $0x20] sm:$0xff]  ;;  %v1004_v10 = vld [vmem:[%s1252_s17 + $0x18] sm:$0xff]  ;;  %v1003_v14 = vld [vmem:[%s1252_s17 + $0x10] sm:$0xff] }
  0x44   : > { %v638_v11 = vld [vmem:[%s1240_s8] sm:$0xff]  ;;  %v639_v15 = vld [vmem:[%s1240_s8 + $0x8] sm:$0xff]  ;;  %v1016_v21 = vld [vmem:[%s1260_s18 + $0x38] sm:$0xff] }
  0x45   : > { %642 = vperm.xlu0 %1066, %v638_v11   ;;  %v994_v16 = vld [vmem:[%s1247_s23 + $0x8] sm:$0xff]  ;;  %v993_v18 = vld [vmem:[%s1247_s23] sm:$0xff]  ;;  %703 = vmatpush.bf16.msra.mxu2 %v1016_v21  ;;  %v1015_v22 = vld [vmem:[%s1260_s18 + $0x30] sm:$0xff] }
  0x46   : > { %v1002_v17 = vld [vmem:[%s1252_s17 + $0x8] sm:$0xff]  ;;  %v1001_v19 = vld [vmem:[%s1252_s17] sm:$0xff]  ;;  %v1012_v25 = vld [vmem:[%s1260_s18 + $0x18] sm:$0xff] }
  0x47   : > { %v992_v20 = vld [vmem:[%s1235_s27] sm:$0xff]  ;;  %v1014_v23 = vld [vmem:[%s1260_s18 + $0x28] sm:$0xff]  ;;  %v1011_v26 = vld [vmem:[%s1260_s18 + $0x10] sm:$0xff] }
  0x48   : > { %v1013_v24 = vld [vmem:[%s1260_s18 + $0x20] sm:$0xff]  ;;  %v1010_v27 = vld [vmem:[%s1260_s18 + $0x8] sm:$0xff] }
  0x49   : > { %543 = vmatpush.bf16.xpose.msra.mxu0 %v999_v3  ;;  %704 = vmatpush.bf16.msra.mxu2 %v1015_v22  ;;  %v1009_v30 = vld [vmem:[%s1260_s18] sm:$0xff]  ;;  %v653_v61 = vld [vmem:[#allocation2 + $0x8] sm:$0xff] }
  0x4a   : > { %605 = vmatpush.bf16.xpose.msra.mxu1 %v1007_v4  ;;  %v652_v58 = vld [vmem:[#allocation2] sm:$0xff] }
  0x4d   : > { %647 = vperm.xlu0 %1066, %v639_v15   ;;  %705 = vmatpush.bf16.msra.mxu2 %v1014_v23 }
  0x51   : > { %544 = vmatpush.bf16.xpose.msra.mxu0 %v998_v5  ;;  %706 = vmatpush.bf16.msra.mxu2 %v1013_v24 }
  0x52   : > { %606 = vmatpush.bf16.xpose.msra.mxu1 %v1006_v6 }
  0x55   : > { %707 = vmatpush.bf16.msra.mxu2 %v1012_v25 }
  0x59   : > { %545 = vmatpush.bf16.xpose.msra.mxu0 %v997_v7  ;;  %708 = vmatpush.bf16.msra.mxu2 %v1011_v26 }
  0x5a   : > { %607 = vmatpush.bf16.xpose.msra.mxu1 %v1005_v8 }
  0x5d   : > { %709 = vmatpush.bf16.msra.mxu2 %v1010_v27 }
  0x61   : > { %546 = vmatpush.bf16.xpose.msra.mxu0 %v996_v9  ;;  %710 = vmatpush.bf16.msra.mxu2 %v1009_v30 }
  0x62   : > { %608 = vmatpush.bf16.xpose.msra.mxu1 %v1004_v10 }
  0x69   : > { %547 = vmatpush.bf16.xpose.msra.mxu0 %v995_v13 }
  0x6a   : > { %609 = vmatpush.bf16.xpose.msra.mxu1 %v1003_v14 }
  0x71   : > { %548 = vmatpush.bf16.xpose.msra.mxu0 %v994_v16 }
  0x72   : > { %610 = vmatpush.bf16.xpose.msra.mxu1 %v1002_v17 }
  0x79   : > { %549 = vmatpush.bf16.xpose.msra.mxu0 %v993_v18 }
  0x7a   : > { %611 = vmatpush.bf16.xpose.msra.mxu1 %v1001_v19 }
  0x80   : > { %550 = vmatmul.bf16.vlgmr.msra.gmra.mxu0 %v992_v20 }
  0x81   : > { %612 = vmatmul.bf16.vlgmr.msra.gmra.mxu1 %v992_v20 }
  0xb7   : > { %v643_v45 = vpop.permute.xlu0 %642 }
  0xbf   : > { %v648_v54 = vpop.permute.xlu0 %647 }
  0xfd   : > { %v551_v28 = vpop.f32.mrf.mxu0 }
  0xfe   : > { %v618_v29 = vmul.f32 %v551_v28, %v551_v28  ;;  %v613_v43 = vpop.f32.mrf.mxu1 }
 0x100   : > { %v620_v31 = vmul.f32 %v618_v29, %v551_v28 }
 0x102   : > { %v622_v32 = vmul.f32 0.044715, %v620_v31 }
 0x104   : > { %v624_v33 = vadd.f32 %v622_v32, %v551_v28 }
 0x105   : > { %v553_v34 = vpop.f32.mrf.mxu0 }
 0x106   : > { %v626_v35 = vmul.f32 0.7978846, %v624_v33  ;;  %v619_v36 = vmul.f32 %v553_v34, %v553_v34  ;;  %v615_v52 = vpop.f32.mrf.mxu1 }
 0x108   : > { %v621_v37 = vmul.f32 %v619_v36, %v553_v34  ;;  %1067 = vtanh.f32 %v626_v35 }
 0x10a   : > { %v623_v38 = vmul.f32 0.044715, %v621_v37 }
 0x10c   : > { %v625_v39 = vadd.f32 %v623_v38, %v553_v34 }
 0x10e   : > { %v1068_v40 = vpop.eup %1067  ;;  %v627_v41 = vmul.f32 0.7978846, %v625_v39 }
 0x10f   : > { %v630_v42 = vadd.f32 1.0, %v1068_v40 }
 0x110   : > { %1069 = vtanh.f32 %v627_v41 }
 0x111   : > { %v632_v44 = vmul.f32 0.5, %v630_v42 }
 0x113   : > { %v634_v47 = vmul.f32 %v632_v44, %v551_v28 }
 0x115   : > { %v636_v50 = vmul.f32 %v634_v47, %v613_v43 }
 0x116   : > { %v1070_v46 = vpop.eup %1069 }
 0x117   : > { %v631_v48 = vadd.f32 1.0, %v1070_v46  ;;  %v650_v55 = vmul.f32 %v643_v45, %v636_v50 }
 0x119   : > { %v633_v49 = vmul.f32 0.5, %v631_v48 }
 0x11b   : > { %v635_v51 = vmul.f32 %v633_v49, %v553_v34 }
 0x11d   : > { %v637_v53 = vmul.f32 %v635_v51, %v615_v52 }
 0x11f   : > { %v651_v56 = vmul.f32 %v648_v54, %v637_v53 }
 0x121   : > { %v654_v57 = vpack.c.bf16 %v651_v56, %v650_v55 }
 0x123   : > { %711 = vmatmul.bf16.vlgmr.msra.gmra.mxu2 %v654_v57 }
 0x1a6   : > { %v712_v59 = vpop.f32.mrf.mxu2 }
 0x1a7   : > { %v717_v60 = vadd.f32 %v712_v59, %v652_v58 }
 0x1a9   : > { %719 = vst [vmem:[#allocation2] sm:$0xff] %v717_v60 }
 0x1ae   : > { %v714_v62 = vpop.f32.mrf.mxu2 }
 0x1af   : > { %v718_v63 = vadd.f32 %v714_v62, %v653_v61 }
 0x1b1   : > { %720 = vst [vmem:[#allocation2 + $0x8] sm:$0xff] %v718_v63 }
 0x1b2 PF: > { %p987_p2 = scmp.ne.s32.totalorder %s1119_s9, 1 }
 0x1b4   : > { %724 = sbr.rel (%p987_p2) target bundleno = 445 (0x1bd), region = 52 }
 0x1b9   : > { %v725_v0 = vld [vmem:[#allocation2] sm:$0xff]  ;;  %v726_v1 = vld [vmem:[#allocation2 + $0x8] sm:$0xff] }
 0x1ba   : > { %v1020_v2 = vpack.c.bf16 %v726_v1, %v725_v0 }
 0x1bc   : > { %1021 = vst [vmem:[%s1265_s28] sm:$0xff] %v1020_v2  }
 0x1bd PF: > { %s30_s12 = sadd.s32 1, %s1135_s12   ;;  %s1325_s13 = sld [smem:[#allocation7_spill]] }
 0x1be   : > { %p27_p3 = scmp.ge.s32.totalorder %s30_s12, 20   ;;  %s1326_s9 = smov %s1127_s11 }
 0x1bf   : > { %s1327_s10 = smov %s1131_s0  ;;  %s1328_s11 = smov %s1331_s1 }
 0x1c0   :  { %29 = sbr.rel (!%p27_p3) target bundleno = 11 (0xb), region = 94 }
 0x1c3   : > { %s1329_s0 = smov %s1325_s13 }

</bundles_post_ra>
